<compile_context>
chip_gen: v7x
topology: tpu7x:2x2x1
jax: 0.10.0
libtpu: 0.0.40
codegen_flags: <defaults>
</compile_context>

<pallas_src>
from functools import partial

import jax
import jax.numpy as jnp
from jax.experimental import pallas as pl
from jax.experimental.pallas import tpu as pltpu


# ----------------------------------------------------------------------------
# Kernel 1: streaming global avg + max pool over the spatial axis (NCHW native)
# ----------------------------------------------------------------------------
def _pool_kernel(x_ref, o_ref, sum_acc, max_acc, *, hw, tile_hw, needs_mask):
    # x_ref   : (1, c_tile, tile_hw)  one (batch, channel-tile, spatial-tile) block
    # o_ref   : (1, c_tile, 2)        col 0 = avg, col 1 = max (resident over k)
    # sum_acc : (c_tile, tile_hw) f32 elementwise running sum
    # max_acc : (c_tile, tile_hw) f32 elementwise running max
    k = pl.program_id(2)
    nk = pl.num_programs(2)

    @pl.when(k == 0)
    def _init():
        sum_acc[...] = jnp.zeros_like(sum_acc)
        max_acc[...] = jnp.full_like(max_acc, -jnp.inf)

    x = x_ref[0].astype(jnp.float32)                       # (c_tile, tile_hw)

    if needs_mask:
        # Tail spatial tile is padded by Pallas with unspecified data: mask it.
        pos = jax.lax.broadcasted_iota(jnp.int32, x.shape, 1) + k * tile_hw
        valid = pos < hw
        x_sum = jnp.where(valid, x, 0.0)
        x_max = jnp.where(valid, x, -jnp.inf)
    else:
        x_sum = x
        x_max = x

    sum_acc[...] = sum_acc[...] + x_sum
    max_acc[...] = jnp.maximum(max_acc[...], x_max)

    @pl.when(k == nk - 1)
    def _finalize():
        avg = jnp.sum(sum_acc[...], axis=1, keepdims=True) * (1.0 / hw)  # (c_tile, 1)
        mx = jnp.max(max_acc[...], axis=1, keepdims=True)                # (c_tile, 1)
        o_ref[0, :, 0:1] = avg.astype(o_ref.dtype)
        o_ref[0, :, 1:2] = mx.astype(o_ref.dtype)


def _pooled_avg_max(x_flat, *, max_tile_bytes):
    """x_flat: (B, C, HW) -> pooled (B, C, 2) float32 (col 0 = avg, col 1 = max)."""
    B, C, HW = x_flat.shape

    # Channel tile (sublane axis): full C, or 256-row slabs for very wide nets.
    c_tile = C if C <= 256 else 256
    num_c = pl.cdiv(C, c_tile)

    # Spatial tile (lane axis): multiple of 128, capped so 2x input buffers +
    # 2x f32 scratch stay small on every chip generation.
    itemsize = jnp.dtype(x_flat.dtype).itemsize
    t = (max_tile_bytes // (c_tile * itemsize)) // 128 * 128
    t = max(t, 128)
    if t >= HW:
        t = HW                      # single spatial step; full-dim block is legal
    num_k = pl.cdiv(HW, t)
    needs_mask = (HW % t) != 0

    kernel = partial(_pool_kernel, hw=HW, tile_hw=t, needs_mask=needs_mask)

    return pl.pallas_call(
        kernel,
        out_shape=jax.ShapeDtypeStruct((B, C, 2), jnp.float32),
        grid_spec=pltpu.PrefetchScalarGridSpec(
            num_scalar_prefetch=0,
            grid=(B, num_c, num_k),
            in_specs=[pl.BlockSpec((1, c_tile, t), lambda b, c, k: (b, c, k))],
            out_specs=pl.BlockSpec((1, c_tile, 2), lambda b, c, k: (b, c, 0)),
            scratch_shapes=[pltpu.VMEM((c_tile, t), jnp.float32),
                            pltpu.VMEM((c_tile, t), jnp.float32)],
        ),
        compiler_params=pltpu.CompilerParams(
            dimension_semantics=("parallel", "parallel", "arbitrary"),
            vmem_limit_bytes=32 * 1024 * 1024,
        ),
    )(x_flat)


# ----------------------------------------------------------------------------
# Kernel 2: shared MLP (two bias-free 1x1 convs) + sigmoid on the pooled stats
# ----------------------------------------------------------------------------
def _mlp_kernel(pooled_ref, w1_ref, w2_ref, o_ref):
    # pooled_ref: (1, C, 2)  columns [avg | max] for one batch element
    # w1_ref    : (Cmid, C)  fc1 weight (nn.Conv2d(C, Cmid, 1) squeezed)
    # w2_ref    : (C, Cmid)  fc2 weight (nn.Conv2d(Cmid, C, 1) squeezed)
    # o_ref     : (1, C, 1)  sigmoid(fc2(relu(fc1(avg))) + fc2(relu(fc1(max))))
    p = pooled_ref[0]                                                   # (C, 2)
    h = jnp.dot(w1_ref[...], p, preferred_element_type=jnp.float32)    # (Cmid, 2)
    h = jnp.maximum(h, 0.0)                                             # ReLU
    o = jnp.dot(w2_ref[...], h, preferred_element_type=jnp.float32)    # (C, 2)
    logits = o[:, 0:1] + o[:, 1:2]                                      # avg + max path
    o_ref[0] = jax.nn.sigmoid(logits).astype(o_ref.dtype)


def channel_attention(x_nchw, w1, w2, *, max_tile_bytes=2 * 1024 * 1024):
    """x_nchw: (B, C, H, W); w1: (Cmid, C) fc1 weight; w2: (C, Cmid) fc2 weight.
    Returns the sigmoid channel-attention map (B, C, 1, 1), like the PyTorch module."""
    B, C, H, W = x_nchw.shape
    Cmid = w1.shape[0]

    # Free reshape (NCHW is contiguous over H, W) -- no transpose, x read once.
    x_flat = x_nchw.reshape(B, C, H * W)
    pooled = _pooled_avg_max(x_flat, max_tile_bytes=max_tile_bytes)     # (B, C, 2)

    attn = pl.pallas_call(
        _mlp_kernel,
        out_shape=jax.ShapeDtypeStruct((B, C, 1), x_nchw.dtype),
        grid_spec=pltpu.PrefetchScalarGridSpec(
            num_scalar_prefetch=0,
            grid=(B,),
            in_specs=[pl.BlockSpec((1, C, 2), lambda b: (b, 0, 0)),
                      pl.BlockSpec((Cmid, C), lambda b: (0, 0)),
                      pl.BlockSpec((C, Cmid), lambda b: (0, 0))],
            out_specs=pl.BlockSpec((1, C, 1), lambda b: (b, 0, 0)),
        ),
        compiler_params=pltpu.CompilerParams(
            dimension_semantics=("parallel",)),
    )(pooled, w1, w2)

    return attn.reshape(B, C)[:, :, None, None]


def channel_attention_ref(x_nchw, w1, w2):
    """Pure-JAX reference matching the PyTorch forward."""
    avg = jnp.mean(x_nchw, axis=(2, 3))          # (B, C)
    mx = jnp.max(x_nchw, axis=(2, 3))            # (B, C)

    def mlp(v):                                  # v: (B, C)
        h = jnp.maximum(v @ w1.T, 0.0)           # (B, Cmid)
        return h @ w2.T                          # (B, C)

    out = jax.nn.sigmoid(mlp(avg) + mlp(mx))
    return out[:, :, None, None]


if __name__ == "__main__":
    keys = jax.random.split(jax.random.PRNGKey(0), 6)

    # --- Case 1: canonical small shape (single spatial tile path) -----------
    B, C, H, W, ratio = 2, 64, 16, 16, 16
    Cmid = C // ratio  # 4
    x = jax.random.normal(keys[0], (B, C, H, W), dtype=jnp.float32)
    w1 = 0.1 * jax.random.normal(keys[1], (Cmid, C), dtype=jnp.float32)   # fc1
    w2 = 0.1 * jax.random.normal(keys[2], (C, Cmid), dtype=jnp.float32)   # fc2

    y = jax.block_until_ready(channel_attention(x, w1, w2))
    assert y.shape == (B, C, 1, 1)
    assert jnp.allclose(y, channel_attention_ref(x, w1, w2), atol=1e-5, rtol=1e-5), \
        "case 1 mismatch vs reference"

    # --- Case 2: force multi-step spatial reduction + tail masking ----------
    B2, C2, H2, W2, r2 = 2, 32, 9, 35, 8          # HW = 315 (not a multiple of 128)
    Cmid2 = C2 // r2                              # 4
    x2 = jax.random.normal(keys[3], (B2, C2, H2, W2), dtype=jnp.float32)
    w1b = 0.1 * jax.random.normal(keys[4], (Cmid2, C2), dtype=jnp.float32)
    w2b = 0.1 * jax.random.normal(keys[5], (C2, Cmid2), dtype=jnp.float32)

    # Small tile cap -> spatial tile = 256 lanes -> 2 reduction steps, masked tail.
    y2 = jax.block_until_ready(
        channel_attention(x2, w1b, w2b, max_tile_bytes=32 * 1024))
    assert y2.shape == (B2, C2, 1, 1)
    assert jnp.allclose(y2, channel_attention_ref(x2, w1b, w2b),
                        atol=1e-5, rtol=1e-5), "case 2 mismatch vs reference"

    print("KERNEL_OK")
</pallas_src>

<mosaic_0001>
module attributes {stable_mosaic.version = 11 : i64} {
  func.func @_pool_kernel(%arg0: i32, %arg1: i32, %arg2: i32, %arg3: memref<1x64x256xf32, #tpu.memory_space<vmem>>, %arg4: memref<1x64x2xf32, #tpu.memory_space<vmem>>, %arg5: memref<64x256xf32, #tpu.memory_space<vmem>>, %arg6: memref<64x256xf32, #tpu.memory_space<vmem>>) attributes {dimension_semantics = [#tpu.dimension_semantics<parallel>, #tpu.dimension_semantics<parallel>, #tpu.dimension_semantics<arbitrary>], iteration_bounds = array<i64: 2, 1, 1>, scalar_prefetch = 0 : i64, scratch_operands = 2 : i64, tpu.core_type = #tpu.core_type<tc>, window_params = [{transform_indices = @transform_0, window_bounds = array<i64: 1, 64, 256>}, {transform_indices = @transform_1, window_bounds = array<i64: 1, 64, 2>}]} {
    %c0_i32 = arith.constant 0 : i32
    %0 = arith.cmpi eq, %arg2, %c0_i32 : i32
    %1 = arith.extui %0 : i1 to i32
    %c0_i32_0 = arith.constant 0 : i32
    %2 = arith.cmpi ne, %1, %c0_i32_0 : i32
    scf.if %2 {
      %cst = arith.constant 0.000000e+00 : f32
      %14 = vector.broadcast %cst : f32 to vector<64x256xf32>
      %c0_13 = arith.constant 0 : index
      %c0_14 = arith.constant 0 : index
      %15 = vector.load %arg5[%c0_13, %c0_14] : memref<64x256xf32, #tpu.memory_space<vmem>>, vector<64x256xf32>
      tpu.vector_store %arg5[%c0_13, %c0_14], %14 {strides = array<i32>} : memref<64x256xf32, #tpu.memory_space<vmem>>, vector<64x256xf32>,
      %cst_15 = arith.constant 0xFF800000 : f32
      %16 = vector.broadcast %cst_15 : f32 to vector<64x256xf32>
      %c0_16 = arith.constant 0 : index
      %c0_17 = arith.constant 0 : index
      %17 = vector.load %arg6[%c0_16, %c0_17] : memref<64x256xf32, #tpu.memory_space<vmem>>, vector<64x256xf32>
      tpu.vector_store %arg6[%c0_16, %c0_17], %16 {strides = array<i32>} : memref<64x256xf32, #tpu.memory_space<vmem>>, vector<64x256xf32>,
    } else {
    }
    %c0 = arith.constant 0 : index
    %c0_1 = arith.constant 0 : index
    %c0_2 = arith.constant 0 : index
    %3 = vector.load %arg3[%c0, %c0_1, %c0_2] : memref<1x64x256xf32, #tpu.memory_space<vmem>>, vector<1x64x256xf32>
    %4 = vector.shape_cast %3 : vector<1x64x256xf32> to vector<64x256xf32>
    %c0_3 = arith.constant 0 : index
    %c0_4 = arith.constant 0 : index
    %5 = vector.load %arg5[%c0_3, %c0_4] : memref<64x256xf32, #tpu.memory_space<vmem>>, vector<64x256xf32>
    %6 = arith.addf %5, %4 : vector<64x256xf32>
    %c0_5 = arith.constant 0 : index
    %c0_6 = arith.constant 0 : index
    %7 = vector.load %arg5[%c0_5, %c0_6] : memref<64x256xf32, #tpu.memory_space<vmem>>, vector<64x256xf32>
    tpu.vector_store %arg5[%c0_5, %c0_6], %6 {strides = array<i32>} : memref<64x256xf32, #tpu.memory_space<vmem>>, vector<64x256xf32>,
    %c0_7 = arith.constant 0 : index
    %c0_8 = arith.constant 0 : index
    %8 = vector.load %arg6[%c0_7, %c0_8] : memref<64x256xf32, #tpu.memory_space<vmem>>, vector<64x256xf32>
    %9 = arith.maximumf %8, %4 : vector<64x256xf32>
    %c0_9 = arith.constant 0 : index
    %c0_10 = arith.constant 0 : index
    %10 = vector.load %arg6[%c0_9, %c0_10] : memref<64x256xf32, #tpu.memory_space<vmem>>, vector<64x256xf32>
    tpu.vector_store %arg6[%c0_9, %c0_10], %9 {strides = array<i32>} : memref<64x256xf32, #tpu.memory_space<vmem>>, vector<64x256xf32>,
    %c0_i32_11 = arith.constant 0 : i32
    %11 = arith.cmpi eq, %arg2, %c0_i32_11 : i32
    %12 = arith.extui %11 : i1 to i32
    %c0_i32_12 = arith.constant 0 : i32
    %13 = arith.cmpi ne, %12, %c0_i32_12 : i32
    scf.if %13 {
      %c0_13 = arith.constant 0 : index
      %c0_14 = arith.constant 0 : index
      %14 = vector.load %arg5[%c0_13, %c0_14] : memref<64x256xf32, #tpu.memory_space<vmem>>, vector<64x256xf32>
      %cst = arith.constant dense<0.000000e+00> : vector<64xf32>
      %15 = vector.multi_reduction <add>, %14, %cst [1] : vector<64x256xf32> to vector<64xf32>
      %16 = vector.shape_cast %15 : vector<64xf32> to vector<64x1xf32>
      %cst_15 = arith.constant 3.906250e-03 : f32
      %17 = vector.broadcast %cst_15 : f32 to vector<64x1xf32>
      %18 = arith.mulf %16, %17 : vector<64x1xf32>
      %c0_16 = arith.constant 0 : index
      %c0_17 = arith.constant 0 : index
      %19 = vector.load %arg6[%c0_16, %c0_17] : memref<64x256xf32, #tpu.memory_space<vmem>>, vector<64x256xf32>
      %cst_18 = arith.constant dense<0xFF800000> : vector<64xf32>
      %20 = vector.multi_reduction <maximumf>, %19, %cst_18 [1] : vector<64x256xf32> to vector<64xf32>
      %21 = vector.shape_cast %20 : vector<64xf32> to vector<64x1xf32>
      %c0_19 = arith.constant 0 : index
      %c0_20 = arith.constant 0 : index
      %c0_21 = arith.constant 0 : index
      %22 = vector.load %arg4[%c0_19, %c0_20, %c0_21] : memref<1x64x2xf32, #tpu.memory_space<vmem>>, vector<1x64x1xf32>
      %23 = vector.shape_cast %22 : vector<1x64x1xf32> to vector<64x1xf32>
      %24 = vector.shape_cast %18 : vector<64x1xf32> to vector<1x64x1xf32>
      tpu.vector_store %arg4[%c0_19, %c0_20, %c0_21], %24 {strides = array<i32>} : memref<1x64x2xf32, #tpu.memory_space<vmem>>, vector<1x64x1xf32>,
      %c0_22 = arith.constant 0 : index
      %c0_23 = arith.constant 0 : index
      %c1 = arith.constant 1 : index
      %25 = vector.load %arg4[%c0_22, %c0_23, %c1] : memref<1x64x2xf32, #tpu.memory_space<vmem>>, vector<1x64x1xf32>
      %26 = vector.shape_cast %25 : vector<1x64x1xf32> to vector<64x1xf32>
      %27 = vector.shape_cast %21 : vector<64x1xf32> to vector<1x64x1xf32>
      tpu.vector_store %arg4[%c0_22, %c0_23, %c1], %27 {strides = array<i32>} : memref<1x64x2xf32, #tpu.memory_space<vmem>>, vector<1x64x1xf32>,
    } else {
    }
    return
  }
  func.func @transform_0(%arg0: i32, %arg1: i32, %arg2: i32) -> (i32, i32, i32) {
    %c0_i32 = arith.constant 0 : i32
    return %arg0, %arg1, %arg2 : i32, i32, i32
  }
  func.func @transform_1(%arg0: i32, %arg1: i32, %arg2: i32) -> (i32, i32, i32) {
    %c0_i32 = arith.constant 0 : i32
    %c0_i32_0 = arith.constant 0 : i32
    return %arg0, %arg1, %c0_i32 : i32, i32, i32
  }
}

</mosaic_0001>

<bundles_post_ra>
// kernel: tpu_custom_call.1
= control target key start
LH: loop header
LB: loop body
LE: loop exit
PB: predicated region body
PF: predicated region fallthrough
CT: control target
= control target key end

     0   :  { %6 = vsyncpa [#allocation5], 0  ;;  %s860_s0 = inlined_call_operand.hbm [shape: f32[2,64,256], index: 0, kind: input, shape index: {}]   ;;  %s861_s1 = inlined_call_operand.vmem [shape: f32[2,64,2], index: 1, kind: output, shape index: {}]  }
   0x1   :  { %8 = vsyncpa [#allocation5 + $0x1], 0  ;;  %s702_s6 = smov 0   ;;  %s704_s7 = smov 0  }
   0x2   :  { %s706_s8 = smov 0   ;;  %s708_s9 = smov 0  }
   0x3   :  { %s710_s10 = smov 0   ;;  %s712_s11 = smov 0  }
   0x4 LB: > { %s535_s12 = sadd.s32 4294967295, %s687_s11   ;;  %s33_s13 = sadd.s32 1, %s683_s10  ;;  %s687_s11 = sphi %s712_s11, %s14_s11   ;;  %s683_s10 = sphi %s710_s10, %s869_s10   ;;  %s679_s9 = sphi %s708_s9, %s868_s9   ;;  %s675_s8 = sphi %s706_s8, %s867_s8   ;;  %s671_s7 = sphi %s704_s7, %s866_s7   ;;  %s667_s6 = sphi %s702_s6, %s865_s6  }
   0x5   : > { %p35_p0 = scmp.ge.s32.totalorder %s33_s13, 2  ;;  %s44_s14 = sadd.s32 1, %s675_s8 }
   0x6   : > { %p51_p1 = scmp.ne.s32.totalorder %s675_s8, %s671_s7  ;;  %p52_p2 = scmp.eq.s32.totalorder %s687_s11, 0 }
   0x7   : > { %s871_s13 = smov (%p35_p0, %s33_s13), 0  ;;  %p57_p4 = scmp.ne.s32.totalorder %s671_s7, %s667_s6 }
   0x8   : > { %p738_p3 = por %p52_p2, %p51_p1  ;;  %s37_s16 = ssub.s32 %s683_s10, %s871_s13 }
   0x9   : > { %p58_p5 = scmp.eq.s32.totalorder %s535_s12, 0  ;;  %p42_p6 = scmp.eq.s32.totalorder %s37_s16, 0 }
   0xa   : > { %p556_p8 = scmp.lt.s32.totalorder %s687_s11, 2  ;;  %s109_s19 = sand.u32 1, %s675_s8  }
   0xb   : > { %p745_p7 = por %p58_p5, %p57_p4  ;;  %s548_s20 = sshll.u32 %s683_s10, 11 }
   0xc   : > { %s751_s18 = scalar_select %p42_p6, %s675_s8, %s44_s14  }
   0xd   : > { %s539_s21 = sshll.u32 %s109_s19, 7  ;;  %s758_s24 = scalar_lea.hbm %s860_s0, %s548_s20 }
   0xe   : > { %s113_s25 = scalar_lea.vmem [#allocation4], %s539_s21  ;;  %p762_p9 = pnand %p556_p8, %p738_p3 }
   0xf   : > { %s125_s26 = sshll.u32 %s113_s25, 4  ;;  %s768_s28 = scalar_lea.sflag [#allocation5], %s109_s19  ;;  %s766_s26 = int_to_ptr.vmem [resolvable:$true] %s125_s26 }
  0x10   : > { %s607_s29 = scalar_lea.hbm %s758_s24, 2048  ;;  %p609_p11 = pneg %p762_p9 }
  0x11   : > { %p608_p10 = scmp.ne.s32.totalorder %s758_s24, %s607_s29  ;;  %s612_s3 = scalar_lea.hbm %s860_s0, 4096 }
  0x12   : > { %p613_p0 = scmp.lt.u32.totalorder %s758_s24, %s860_s0  ;;  %p614_p1 = scmp.lt.u32.totalorder %s612_s3, %s607_s29 }
  0x13   : > { %p610_p12 = pnand %p609_p11, %p608_p10  ;;  %p616_p3 = scmp.lt.u32.totalorder %s607_s29, %s758_s24 }
  0x14   : > { %p615_p2 = por %p614_p1, %p613_p0 }
  0x15   : > { %p611_p13 = pneg %p610_p12 }
  0x16   : > { %p617_p4 = por %p616_p3, %p615_p2 }
  0x18   : > { %p618_p5 = pnand %p617_p4, %p611_p13 }
  0x1a   : > { %621 = shalt.err (!%p618_p5)
}
  0x1b   : > { %s622_s6 = scalar_lea.vmem %s766_s26, 2048  ;;  %s689_s12 = smov [#allocation4]  }
  0x1c   : > { %p623_p6 = scmp.ne.s32.totalorder %s766_s26, %s622_s6  ;;  %s627_s14 = sshll.u32 %s689_s12, 4  ;;  %s628_s14 = int_to_ptr.vmem [resolvable:$false] %s627_s14 }
  0x1d   : > { %s629_s15 = scalar_lea.vmem %s628_s14, 4096  ;;  %p630_p12 = scmp.lt.s32.totalorder %s766_s26, %s628_s14 }
  0x1e   : > { %p625_p8 = pnand %p623_p6, %p609_p11  ;;  %p631_p0 = scmp.lt.s32.totalorder %s629_s15, %s622_s6 }
  0x20   : > { %p626_p10 = pneg %p625_p8  ;;  %p632_p1 = por %p631_p0, %p630_p12 }
  0x22   : > { %p633_p2 = pnand %p632_p1, %p626_p10 }
  0x24   : > { %636 = shalt.err (!%p633_p2)
}
  0x25   : > { %s690_s16 = smov 256   ;;  %s691_s19 = smov 16  }
  0x26   : > { %555 = dma.hbm_to_vmem [thread:$0]  (!%p762_p9), %s758_s24, 2048, %s766_s26, %s768_s28, %s690_s16, %s690_s16, %s691_s19  }
  0x27   : > { %p542_p11 = scmp.ge.s32.totalorder %s687_s11, 1  ;;  %p133_p13 = scmp.lt.s32.totalorder %s687_s11, 3 }
  0x29   : > { %p134_p3 = pnand %p542_p11, %p133_p13 }
  0x2a   : > { %s139_s20 = sand.u32 (!%p134_p3), 1, %s671_s7  }
  0x2b   : > { %137 = sbr.rel (%p134_p3) target bundleno = 226 (0xe2), region = 24  ;;  %s543_s21 = sshll.u32 (!%p134_p3), %s139_s20, 7 }
  0x2c   : > { %s140_s22 = scalar_lea.sflag (!%p134_p3), [#allocation5], %s139_s20  ;;  %s143_s23 = scalar_lea.vmem (!%p134_p3), [#allocation4], %s543_s21 }
  0x32   : > { %662 = dma.done.wait (%p745_p7), %s140_s22, 2048  }
  0x33   : > { %664 = vsyncadd (%p745_p7), %s140_s22, 4294965248  ;;  %v218_v0 = vld [vmem:[%s143_s23 + $0x20] sm:$0xff]  ;;  %v219_v1 = vld [vmem:[%s143_s23 + $0x28] sm:$0xff]  ;;  %p169_p7 = scmp.lt.s32.totalorder %s679_s9, 1  ;;  %vm417_vm0 = vcmask 7168   ;;  %vm426_vm1 = vcmask 15368  }
  0x34   : > { %v214_v2 = vld [vmem:[%s143_s23] sm:$0xff]  ;;  %v351_v3 = vadd.f32 %v219_v1, %v218_v0  ;;  %v215_v4 = vld [vmem:[%s143_s23 + $0x8] sm:$0xff]  ;;  %v220_v5 = vld [vmem:[%s143_s23 + $0x30] sm:$0xff]  ;;  %v399_v27 = vmax.f32 %v218_v0, %v219_v1 }
  0x35   : > { %v221_v6 = vld [vmem:[%s143_s23 + $0x38] sm:$0xff]  ;;  %v345_v7 = vadd.f32 %v215_v4, %v214_v2  ;;  %v216_v8 = vld [vmem:[%s143_s23 + $0x10] sm:$0xff]  ;;  %v222_v14 = vld [vmem:[%s143_s23 + $0x40] sm:$0xff]  ;;  %v393_v25 = vmax.f32 %v214_v2, %v215_v4  ;;  %s873_s9 = smov (!%p169_p7, %s679_s9), 1 }
  0x36   : > { %v217_v9 = vld [vmem:[%s143_s23 + $0x18] sm:$0xff]  ;;  %352 = vadd.xlane.f32.xlu1 %v351_v3  ;;  %v354_v10 = vadd.f32 %v221_v6, %v220_v5  ;;  %v224_v12 = vld [vmem:[%s143_s23 + $0x50] sm:$0xff]  ;;  %v223_v15 = vld [vmem:[%s143_s23 + $0x48] sm:$0xff]  ;;  %v402_v26 = vmax.f32 %v220_v5, %v221_v6  ;;  %s549_s17 = sshll.u32 %s873_s9, 6 }
  0x37   : > { %346 = vadd.xlane.f32.xlu0 %v345_v7  ;;  %v348_v11 = vadd.f32 %v217_v9, %v216_v8  ;;  %v225_v13 = vld [vmem:[%s143_s23 + $0x58] sm:$0xff]  ;;  %v357_v17 = vadd.f32 %v223_v15, %v222_v14  ;;  %v228_v18 = vld [vmem:[%s143_s23 + $0x70] sm:$0xff]  ;;  %v226_v20 = vld [vmem:[%s143_s23 + $0x60] sm:$0xff]  ;;  %v396_v24 = vmax.f32 %v216_v8, %v217_v9  ;;  %v405_v29 = vmax.f32 %v222_v14, %v223_v15  ;;  %s808_s26 = scalar_lea.vmem %s861_s1, %s549_s17 }
  0x38   : > { %v360_v16 = vadd.f32 %v225_v13, %v224_v12  ;;  %v229_v19 = vld [vmem:[%s143_s23 + $0x78] sm:$0xff]  ;;  %v227_v21 = vld [vmem:[%s143_s23 + $0x68] sm:$0xff]  ;;  %v408_v28 = vmax.f32 %v224_v12, %v225_v13 }
  0x39   : > { %v366_v22 = vadd.f32 %v229_v19, %v228_v18  ;;  %v363_v23 = vadd.f32 %v227_v21, %v226_v20  ;;  %v414_v30 = vmax.f32 %v228_v18, %v229_v19  ;;  %v411_v31 = vmax.f32 %v226_v20, %v227_v21 }
  0x3a   : > { %355 = vadd.xlane.f32.xlu1 %v354_v10 }
  0x3b   : > { %349 = vadd.xlane.f32.xlu0 %v348_v11 }
  0x3e   : > { %361 = vadd.xlane.f32.xlu1 %v360_v16 }
  0x3f   : > { %358 = vadd.xlane.f32.xlu0 %v357_v17 }
  0x42   : > { %367 = vadd.xlane.f32.xlu1 %v366_v22 }
  0x43   : > { %364 = vadd.xlane.f32.xlu0 %v363_v23 }
  0x46   : > { %397 = vmax.xlane.f32.xlu1 %v396_v24 }
  0x47   : > { %394 = vmax.xlane.f32.xlu0 %v393_v25 }
  0x4a   : > { %403 = vmax.xlane.f32.xlu1 %v402_v26 }
  0x4b   : > { %400 = vmax.xlane.f32.xlu0 %v399_v27 }
  0x4e   : > { %409 = vmax.xlane.f32.xlu1 %v408_v28 }
  0x4f   : > { %406 = vmax.xlane.f32.xlu0 %v405_v29 }
  0x52   : > { %415 = vmax.xlane.f32.xlu1 %v414_v30 }
  0x53   : > { %412 = vmax.xlane.f32.xlu0 %v411_v31 }
  0xc3   : > { %v353_v32 = vpop.xlane.xlu1 %352 }
  0xc4   : > { %v371_v33 = vmul.f32 0.00390625, %v353_v32  ;;  %v347_v34 = vpop.xlane.xlu0 %346 }
  0xc5   : > { %v369_v35 = vmul.f32 0.00390625, %v347_v34 }
  0xc6   : > { %420 = vst.msk [vmem:[%s808_s26 + $0x10] sm:$0xff] %vm417_vm0, %v371_v33 }
  0xc7   : > { %418 = vst.msk [vmem:[%s808_s26] sm:$0xff] %vm417_vm0, %v369_v35  ;;  %v356_v36 = vpop.xlane.xlu1 %355 }
  0xc8   : > { %v372_v37 = vmul.f32 0.00390625, %v356_v36  ;;  %v350_v38 = vpop.xlane.xlu0 %349 }
  0xc9   : > { %v370_v39 = vmul.f32 0.00390625, %v350_v38 }
  0xca   : > { %421 = vst.msk [vmem:[%s808_s26 + $0x18] sm:$0xff] %vm417_vm0, %v372_v37 }
  0xcb   : > { %419 = vst.msk [vmem:[%s808_s26 + $0x8] sm:$0xff] %vm417_vm0, %v370_v39  ;;  %v362_v40 = vpop.xlane.xlu1 %361 }
  0xcc   : > { %v374_v41 = vmul.f32 0.00390625, %v362_v40  ;;  %v359_v42 = vpop.xlane.xlu0 %358 }
  0xcd   : > { %v373_v43 = vmul.f32 0.00390625, %v359_v42 }
  0xce   : > { %423 = vst.msk [vmem:[%s808_s26 + $0x28] sm:$0xff] %vm417_vm0, %v374_v41 }
  0xcf   : > { %422 = vst.msk [vmem:[%s808_s26 + $0x20] sm:$0xff] %vm417_vm0, %v373_v43  ;;  %v368_v44 = vpop.xlane.xlu1 %367 }
  0xd0   : > { %v376_v45 = vmul.f32 0.00390625, %v368_v44  ;;  %v365_v46 = vpop.xlane.xlu0 %364 }
  0xd1   : > { %v375_v47 = vmul.f32 0.00390625, %v365_v46 }
  0xd2   : > { %425 = vst.msk [vmem:[%s808_s26 + $0x38] sm:$0xff] %vm417_vm0, %v376_v45 }
  0xd3   : > { %424 = vst.msk [vmem:[%s808_s26 + $0x30] sm:$0xff] %vm417_vm0, %v375_v47  ;;  %v398_v48 = vpop.xlane.xlu1 %397 }
  0xd4   : > { %428 = vst.msk [vmem:[%s808_s26 + $0x8] sm:$0xff] %vm426_vm1, %v398_v48  ;;  %v395_v49 = vpop.xlane.xlu0 %394 }
  0xd5   : > { %427 = vst.msk [vmem:[%s808_s26] sm:$0xff] %vm426_vm1, %v395_v49 }
  0xd7   : > { %v404_v50 = vpop.xlane.xlu1 %403 }
  0xd8   : > { %430 = vst.msk [vmem:[%s808_s26 + $0x18] sm:$0xff] %vm426_vm1, %v404_v50  ;;  %v401_v51 = vpop.xlane.xlu0 %400 }
  0xd9   : > { %429 = vst.msk [vmem:[%s808_s26 + $0x10] sm:$0xff] %vm426_vm1, %v401_v51 }
  0xdb   : > { %v410_v52 = vpop.xlane.xlu1 %409 }
  0xdc   : > { %432 = vst.msk [vmem:[%s808_s26 + $0x28] sm:$0xff] %vm426_vm1, %v410_v52  ;;  %v407_v53 = vpop.xlane.xlu0 %406 }
  0xdd   : > { %431 = vst.msk [vmem:[%s808_s26 + $0x20] sm:$0xff] %vm426_vm1, %v407_v53 }
  0xdf   : > { %v416_v54 = vpop.xlane.xlu1 %415 }
  0xe0   : > { %434 = vst.msk [vmem:[%s808_s26 + $0x38] sm:$0xff] %vm426_vm1, %v416_v54  ;;  %v413_v55 = vpop.xlane.xlu0 %412 }
  0xe1   : > { %433 = vst.msk [vmem:[%s808_s26 + $0x30] sm:$0xff] %vm426_vm1, %v413_v55 }
  0xe2 PF: > { %s14_s11 = sadd.s32 1, %s687_s11   ;;  %s865_s6 = smov %s671_s7 }
  0xe3   : > { %p11_p9 = scmp.ge.s32.totalorder %s14_s11, 4   ;;  %s866_s7 = smov %s675_s8 }
  0xe4   : > { %s867_s8 = smov %s751_s18  ;;  %s868_s9 = smov %s683_s10 }
  0xe5   : > { %s869_s10 = smov %s871_s13  ;;  %13 = sbr.rel (!%p11_p9) target bundleno = 4 (0x4), region = 72 }
  0xec   :  { %465 = vsyncpa [#allocation5], 1 }
  0xed   :  { %467 = vsyncpa [#allocation5 + $0x1], 1 }

</bundles_post_ra>
